<compile_context>
chip_gen: v5e
topology: v5e:2x2
jax: 0.10.0
libtpu: 0.0.40
codegen_flags: <defaults>
</compile_context>

<pallas_src>
import functools
import math

import jax
import jax.numpy as jnp
from jax import lax
from jax.experimental import pallas as pl
from jax.experimental.pallas import tpu as pltpu

# module constants (from the PyTorch script)
BLOCK_SIZE = 64     # max sequence length / tril size
N_EMBD = 384        # embedding dim
HEAD_SIZE = 64      # head_size used for this Head instance


def _head_kernel(x_ref, wqkv_ref, o_ref, *, head_size):
    """One batch element per grid step: fused QKV projection + causal attention."""
    x = x_ref[...]                                    # (T, C) bf16
    T = x.shape[0]
    scale = head_size ** -0.5

    # Fused projection: (T, C) @ (C, 3*hs) -> (T, 3*hs), f32 accumulation on the MXU.
    qkv = jnp.dot(x, wqkv_ref[...], preferred_element_type=jnp.float32)
    q = qkv[:, 0 * head_size:1 * head_size]           # (T, hs) f32
    k = qkv[:, 1 * head_size:2 * head_size]
    v = qkv[:, 2 * head_size:3 * head_size]

    # scores = q @ k^T (contract last dims; no materialized transpose), f32 accum.
    wei = lax.dot_general(
        q.astype(jnp.bfloat16), k.astype(jnp.bfloat16),
        dimension_numbers=(((1,), (1,)), ((), ())),
        preferred_element_type=jnp.float32,
    ) * scale                                         # (T, T)

    # causal mask (tril): keep where row >= col
    row = lax.broadcasted_iota(jnp.int32, (T, T), 0)
    col = lax.broadcasted_iota(jnp.int32, (T, T), 1)
    wei = jnp.where(row >= col, wei, -jnp.inf)

    # numerically stable softmax; divide replaced by EUP reciprocal + multiply
    m = jnp.max(wei, axis=-1, keepdims=True)
    e = jnp.exp(wei - m)
    s = jnp.sum(e, axis=-1, keepdims=True)
    p = e * pl.reciprocal(s, approx=True)

    out = jnp.dot(p.astype(jnp.bfloat16), v.astype(jnp.bfloat16),
                  preferred_element_type=jnp.float32)  # (T, hs)
    o_ref[...] = out.astype(o_ref.dtype)


def head_attention(x, wq, wk, wv):
    """x: (B, T, C) f32; wq/wk/wv: (C, hs) f32 (already transposed vs torch Linear.weight)."""
    B, T, C = x.shape
    hs = wq.shape[1]

    # Fuse the three projection weights into one lane-dense (C, 3*hs) bf16 matrix.
    wqkv = jnp.concatenate([wq, wk, wv], axis=1).astype(jnp.bfloat16)
    x_bf16 = x.astype(jnp.bfloat16)

    kernel = functools.partial(_head_kernel, head_size=hs)

    return pl.pallas_call(
        kernel,
        out_shape=jax.ShapeDtypeStruct((B, T, hs), jnp.float32),
        grid_spec=pltpu.PrefetchScalarGridSpec(
            num_scalar_prefetch=0,
            grid=(B,),
            in_specs=[
                pl.BlockSpec((None, T, C), lambda b: (b, 0, 0)),   # x  (batch dim squeezed)
                pl.BlockSpec((C, 3 * hs), lambda b: (0, 0)),       # fused Wqkv (VMEM-resident)
            ],
            out_specs=pl.BlockSpec((None, T, hs), lambda b: (b, 0, 0)),
        ),
        compiler_params=pltpu.CompilerParams(
            dimension_semantics=("parallel",),   # v7x: one batch element per TensorCore
        ),
    )(x_bf16, wqkv)


def reference_head(x, wq, wk, wv):
    """Plain-JAX f32 reference mirroring the PyTorch Head.forward (eval mode)."""
    B, T, C = x.shape
    hs = wq.shape[1]
    q = x @ wq
    k = x @ wk
    v = x @ wv
    wei = (q @ jnp.swapaxes(k, -2, -1)) * (hs ** -0.5)
    tril = jnp.tril(jnp.ones((T, T)))
    wei = jnp.where(tril == 0, -jnp.inf, wei)
    wei = jax.nn.softmax(wei, axis=-1)
    return wei @ v


if __name__ == "__main__":
    key = jax.random.PRNGKey(0)
    kx, kq, kk, kv = jax.random.split(key, 4)

    B, T, C, hs = 2, BLOCK_SIZE, N_EMBD, HEAD_SIZE

    x = jax.random.normal(kx, (B, T, C), dtype=jnp.float32)

    # nn.Linear-style init U(-1/sqrt(fan_in), 1/sqrt(fan_in)); stored transposed (C, hs)
    # so the kernel does x @ W directly.
    lim = 1.0 / math.sqrt(C)
    wq = jax.random.uniform(kq, (C, hs), jnp.float32, -lim, lim)
    wk = jax.random.uniform(kk, (C, hs), jnp.float32, -lim, lim)
    wv = jax.random.uniform(kv, (C, hs), jnp.float32, -lim, lim)

    out = head_attention(x, wq, wk, wv)
    out = jax.block_until_ready(out)

    ref = reference_head(x, wq, wk, wv)
    assert out.shape == (B, T, hs)
    # bf16 MXU inputs + approx reciprocal -> loosened tolerance vs the f32 reference.
    assert jnp.allclose(out, ref, atol=3e-2, rtol=3e-2), "mismatch vs reference"

    print("KERNEL_OK")
</pallas_src>

<mosaic_0001>
module attributes {stable_mosaic.version = 11 : i64} {
  func.func @_head_kernel(%arg0: i32, %arg1: memref<1x64x384xbf16, #tpu.memory_space<vmem>>, %arg2: memref<384x192xbf16, #tpu.memory_space<vmem>>, %arg3: memref<1x64x64xf32, #tpu.memory_space<vmem>>) attributes {dimension_semantics = [#tpu.dimension_semantics<parallel>], iteration_bounds = array<i64: 2>, scalar_prefetch = 0 : i64, scratch_operands = 0 : i64, tpu.core_type = #tpu.core_type<tc>, window_params = [{transform_indices = @transform_0, window_bounds = array<i64: 1, 64, 384>}, {pipeline_mode = #tpu.pipeline_mode<synchronous>, transform_indices = @transform_1, window_bounds = array<i64: 384, 192>}, {transform_indices = @transform_2, window_bounds = array<i64: 1, 64, 64>}]} {
    %c0 = arith.constant 0 : index
    %c0_0 = arith.constant 0 : index
    %c0_1 = arith.constant 0 : index
    %0 = vector.load %arg1[%c0, %c0_0, %c0_1] : memref<1x64x384xbf16, #tpu.memory_space<vmem>>, vector<1x64x384xbf16>
    %1 = vector.shape_cast %0 : vector<1x64x384xbf16> to vector<64x384xbf16>
    %c0_2 = arith.constant 0 : index
    %c0_3 = arith.constant 0 : index
    %2 = vector.load %arg2[%c0_2, %c0_3] : memref<384x192xbf16, #tpu.memory_space<vmem>>, vector<384x192xbf16>
    %cst = arith.constant dense<0.000000e+00> : vector<64x192xf32>
    %3 = tpu.matmul %1, %2, %cst {dimension_numbers = #tpu.dot_dimension_numbers<[1], [0], [0], [1], [0, 0, 1, 1], [], []>} : vector<64x384xbf16>, vector<384x192xbf16>, vector<64x192xf32> -> vector<64x192xf32>
    %4 = vector.extract_strided_slice %3 {offsets = [0, 0], sizes = [64, 64], strides = [1, 1]} : vector<64x192xf32> to vector<64x64xf32>
    %5 = vector.extract_strided_slice %3 {offsets = [0, 64], sizes = [64, 64], strides = [1, 1]} : vector<64x192xf32> to vector<64x64xf32>
    %6 = vector.extract_strided_slice %3 {offsets = [0, 128], sizes = [64, 64], strides = [1, 1]} : vector<64x192xf32> to vector<64x64xf32>
    %7 = arith.truncf %4 : vector<64x64xf32> to vector<64x64xbf16>
    %8 = arith.truncf %5 : vector<64x64xf32> to vector<64x64xbf16>
    %cst_4 = arith.constant dense<0.000000e+00> : vector<64x64xf32>
    %9 = tpu.matmul %7, %8, %cst_4 {dimension_numbers = #tpu.dot_dimension_numbers<[1], [1], [0], [0], [0, 0, 1, 0], [], []>} : vector<64x64xbf16>, vector<64x64xbf16>, vector<64x64xf32> -> vector<64x64xf32>
    %cst_5 = arith.constant 1.250000e-01 : f32
    %10 = vector.broadcast %cst_5 : f32 to vector<64x64xf32>
    %11 = arith.mulf %9, %10 : vector<64x64xf32>
    %12 = tpu.iota {dimensions = array<i32: 0>} : vector<64x64xi32>
    %13 = tpu.iota {dimensions = array<i32: 1>} : vector<64x64xi32>
    %14 = arith.cmpi sge, %12, %13 : vector<64x64xi32>
    %cst_6 = arith.constant 0xFF800000 : f32
    %15 = vector.broadcast %cst_6 : f32 to vector<64x64xf32>
    %16 = arith.select %14, %11, %15 : vector<64x64xi1>, vector<64x64xf32>
    %cst_7 = arith.constant dense<0xFF800000> : vector<64xf32>
    %17 = vector.multi_reduction <maximumf>, %16, %cst_7 [1] : vector<64x64xf32> to vector<64xf32>
    %18 = vector.shape_cast %17 : vector<64xf32> to vector<64x1xf32>
    %19 = vector.broadcast %18 : vector<64x1xf32> to vector<64x64xf32>
    %20 = arith.subf %16, %19 : vector<64x64xf32>
    %21 = math.exp %20 : vector<64x64xf32>
    %cst_8 = arith.constant dense<0.000000e+00> : vector<64xf32>
    %22 = vector.multi_reduction <add>, %21, %cst_8 [1] : vector<64x64xf32> to vector<64xf32>
    %23 = vector.shape_cast %22 : vector<64xf32> to vector<64x1xf32>
    %24 = tpu.reciprocal %23 {approx = true} : vector<64x1xf32> -> vector<64x1xf32>
    %25 = vector.broadcast %24 : vector<64x1xf32> to vector<64x64xf32>
    %26 = arith.mulf %21, %25 : vector<64x64xf32>
    %27 = arith.truncf %26 : vector<64x64xf32> to vector<64x64xbf16>
    %28 = arith.truncf %6 : vector<64x64xf32> to vector<64x64xbf16>
    %cst_9 = arith.constant dense<0.000000e+00> : vector<64x64xf32>
    %29 = tpu.matmul %27, %28, %cst_9 {dimension_numbers = #tpu.dot_dimension_numbers<[1], [0], [0], [1], [0, 0, 1, 1], [], []>} : vector<64x64xbf16>, vector<64x64xbf16>, vector<64x64xf32> -> vector<64x64xf32>
    %c0_10 = arith.constant 0 : index
    %c0_11 = arith.constant 0 : index
    %c0_12 = arith.constant 0 : index
    %30 = vector.load %arg3[%c0_10, %c0_11, %c0_12] : memref<1x64x64xf32, #tpu.memory_space<vmem>>, vector<1x64x64xf32>
    %31 = vector.shape_cast %30 : vector<1x64x64xf32> to vector<64x64xf32>
    %32 = vector.shape_cast %29 : vector<64x64xf32> to vector<1x64x64xf32>
    tpu.vector_store %arg3[%c0_10, %c0_11, %c0_12], %32 {strides = array<i32>} : memref<1x64x64xf32, #tpu.memory_space<vmem>>, vector<1x64x64xf32>,
    return
  }
  func.func @transform_0(%arg0: i32) -> (i32, i32, i32) {
    %c0_i32 = arith.constant 0 : i32
    %c0_i32_0 = arith.constant 0 : i32
    %c0_i32_1 = arith.constant 0 : i32
    return %arg0, %c0_i32, %c0_i32_0 : i32, i32, i32
  }
  func.func @transform_1(%arg0: i32) -> (i32, i32) {
    %c0_i32 = arith.constant 0 : i32
    %c0_i32_0 = arith.constant 0 : i32
    %c0_i32_1 = arith.constant 0 : i32
    return %c0_i32, %c0_i32_0 : i32, i32
  }
  func.func @transform_2(%arg0: i32) -> (i32, i32, i32) {
    %c0_i32 = arith.constant 0 : i32
    %c0_i32_0 = arith.constant 0 : i32
    %c0_i32_1 = arith.constant 0 : i32
    return %arg0, %c0_i32, %c0_i32_0 : i32, i32, i32
  }
}

</mosaic_0001>

<bundles_post_ra>
// kernel: tpu_custom_call.1
= control target key start
LH: loop header
LB: loop body
LE: loop exit
PB: predicated region body
PF: predicated region fallthrough
CT: control target
= control target key end

     0   :  { %7 = vsyncpa [#allocation3], 0  ;;  %s2024_s0 = inlined_call_operand.vmem [shape: bf16[2,64,384], index: 0, kind: input, shape index: {}]   ;;  %s2025_s1 = inlined_call_operand.vmem [shape: bf16[384,192], index: 1, kind: input, shape index: {}]   ;;  %s2026_s2 = inlined_call_operand.hbm [shape: f32[2,64,64], index: 2, kind: output, shape index: {}]  }
   0x1   :  { %9 = vsyncpa [#allocation3 + $0x1], 0  ;;  %s1490_s9 = smov 0   ;;  %s1492_s10 = smov 0  }
   0x2   :  { %s1494_s11 = smov 0   ;;  %s1496_s12 = smov 0  }
   0x3 LB: > { %s1511_s13 = sadd.s32 4294967295, %s1470_s12   ;;  %s1013_s14 = sadd.s32 4294967294, %s1470_s12   ;;  %s1470_s12 = sphi %s1496_s12, %s2032_s12   ;;  %s1466_s11 = sphi %s1494_s11, %s2031_s11   ;;  %s1462_s10 = sphi %s1492_s10, %s2030_s10   ;;  %s1458_s9 = sphi %s1490_s9, %s2029_s9  }
   0x4   : > { %s1515_s15 = sadd.s32 1, %s1470_s12   ;;  %s69_s16 = sadd.s32 1, %s1466_s11 }
   0x5   : > { %s66_s17 = ssub.s32 %s1470_s12, %s1515_s15  ;;  %p79_p0 = scmp.ne.s32.totalorder %s1466_s11, %s1462_s10 }
   0x6   : > { %p67_p1 = scmp.eq.s32.totalorder %s66_s17, 0  ;;  %p80_p2 = scmp.eq.s32.totalorder %s1511_s13, 1 }
   0x7   : > { %p85_p3 = scmp.ne.s32.totalorder %s1462_s10, %s1458_s9  ;;  %p86_p4 = scmp.eq.s32.totalorder %s1013_s14, 1 }
   0x8   : > { %s1526_s18 = scalar_select %p67_p1, %s1466_s11, %s69_s16  }
   0x9   : > { %p1528_p5 = por %p80_p2, %p79_p0  ;;  %p1532_p6 = por %p86_p4, %p85_p3 }
   0xa   : > { %p1016_p7 = scmp.ge.s32.totalorder %s1470_s12, 1  ;;  %p115_p8 = scmp.lt.s32.totalorder %s1470_s12, 3 }
   0xc   : > { %p116_p9 = pnand %p1016_p7, %p115_p8 }
   0xd   : > { %p137_p10 = scmp.lt.s32.totalorder (!%p116_p9), %s1511_s13, 1  ;;  %s134_s29 = sand.u32 (!%p116_p9), 1, %s1462_s10  }
   0xe   : > { %119 = sbr.rel (%p116_p9) target bundleno = 985 (0x3d9), region = 28  ;;  %s1017_s30 = sshll.u32 (!%p116_p9), %s134_s29, 6 }
   0xf   : > { %s136_s3 = scalar_lea.vmem (!%p116_p9), [#allocation2], %s1017_s30  ;;  %s1332_s4 = sshll.u32 (!%p116_p9), %s1511_s13, 6 }
  0x10   : > { %s947_s7 = scalar_lea.hbm (!%p116_p9), %s2026_s2, %s1332_s4  ;;  %s936_s16 = scalar_lea.sflag (!%p116_p9), [#allocation3], %s134_s29 }
  0x11   : > { %s950_s14 = sshll.u32 (!%p116_p9), %s947_s7, 4  ;;  %s1428_s23 = scalar_lea.hbm (!%p116_p9), %s2026_s2, 128  ;;  %s951_s14 = int_to_ptr.hbm [resolvable:$true] %s950_s14 }
  0x13   : > { %v1125_v0 = vld [vmem:[%s2025_s1 + $0x70] sm:$0xf]  ;;  %v1299_v1 = vld [vmem:[%s2025_s1 + $0x74] sm:$0xf0]  ;;  %v1117_v9 = vld [vmem:[%s2025_s1 + $0x60] sm:$0xf] }
  0x14   : > { %v1189_v2 = vld [vmem:[%s2025_s1 + $0xf0] sm:$0xf]  ;;  %v1126_v3 = vor.u32 %v1299_v1, %v1125_v0  ;;  %v1315_v4 = vld [vmem:[%s2025_s1 + $0xf4] sm:$0xf0]  ;;  %v1297_v10 = vld [vmem:[%s2025_s1 + $0x64] sm:$0xf0] }
  0x15   : > { %v1253_v5 = vld [vmem:[%s2025_s1 + $0x170] sm:$0xf]  ;;  %v1331_v6 = vld [vmem:[%s2025_s1 + $0x174] sm:$0xf0]  ;;  %v1190_v7 = vor.u32 %v1315_v4, %v1189_v2  ;;  %v1181_v11 = vld [vmem:[%s2025_s1 + $0xe0] sm:$0xf]  ;;  %v1118_v12 = vor.u32 %v1297_v10, %v1117_v9 }
  0x16   : > { %v1254_v8 = vor.u32 %v1331_v6, %v1253_v5  ;;  %511 = vmatpush.bf16.msra.mxu0 %v1126_v3  ;;  %v1313_v13 = vld [vmem:[%s2025_s1 + $0xe4] sm:$0xf0]  ;;  %v1245_v14 = vld [vmem:[%s2025_s1 + $0x160] sm:$0xf]  ;;  %v1109_v18 = vld [vmem:[%s2025_s1 + $0x50] sm:$0xf] }
  0x17   : > { %v1329_v15 = vld [vmem:[%s2025_s1 + $0x164] sm:$0xf0]  ;;  %540 = vmatpush.bf16.msra.mxu1 %v1190_v7  ;;  %v1182_v16 = vor.u32 %v1313_v13, %v1181_v11  ;;  %v1295_v19 = vld [vmem:[%s2025_s1 + $0x54] sm:$0xf0]  ;;  %v1173_v20 = vld [vmem:[%s2025_s1 + $0xd0] sm:$0xf] }
  0x18   : > { %569 = vmatpush.bf16.msra.mxu2 %v1254_v8  ;;  %v1246_v17 = vor.u32 %v1329_v15, %v1245_v14  ;;  %v1311_v21 = vld [vmem:[%s2025_s1 + $0xd4] sm:$0xf0]  ;;  %v1237_v22 = vld [vmem:[%s2025_s1 + $0x150] sm:$0xf]  ;;  %v1110_v24 = vor.u32 %v1295_v19, %v1109_v18  ;;  %v1101_v27 = vld [vmem:[%s2025_s1 + $0x40] sm:$0xf] }
  0x19   : > { %v1327_v23 = vld [vmem:[%s2025_s1 + $0x154] sm:$0xf0]  ;;  %v1174_v25 = vor.u32 %v1311_v21, %v1173_v20  ;;  %v1293_v28 = vld [vmem:[%s2025_s1 + $0x44] sm:$0xf0]  ;;  %v1165_v29 = vld [vmem:[%s2025_s1 + $0xc0] sm:$0xf] }
  0x1a   : > { %512 = vmatpush.bf16.msra.mxu0 %v1118_v12  ;;  %v1238_v26 = vor.u32 %v1327_v23, %v1237_v22  ;;  %v1309_v30 = vld [vmem:[%s2025_s1 + $0xc4] sm:$0xf0]  ;;  %v1229_v31 = vld [vmem:[%s2025_s1 + $0x140] sm:$0xf]  ;;  %v1102_v33 = vor.u32 %v1293_v28, %v1101_v27  ;;  %v1093_v36 = vld [vmem:[%s2025_s1 + $0x30] sm:$0xf] }
  0x1b   : > { %541 = vmatpush.bf16.msra.mxu1 %v1182_v16  ;;  %v1325_v32 = vld [vmem:[%s2025_s1 + $0x144] sm:$0xf0]  ;;  %v1166_v34 = vor.u32 %v1309_v30, %v1165_v29  ;;  %v1291_v37 = vld [vmem:[%s2025_s1 + $0x34] sm:$0xf0]  ;;  %v1157_v38 = vld [vmem:[%s2025_s1 + $0xb0] sm:$0xf] }
  0x1c   : > { %570 = vmatpush.bf16.msra.mxu2 %v1246_v17  ;;  %v1230_v35 = vor.u32 %v1325_v32, %v1229_v31  ;;  %v1307_v39 = vld [vmem:[%s2025_s1 + $0xb4] sm:$0xf0]  ;;  %v1221_v40 = vld [vmem:[%s2025_s1 + $0x130] sm:$0xf]  ;;  %v1094_v42 = vor.u32 %v1291_v37, %v1093_v36  ;;  %v1085_v43 = vld [vmem:[%s2025_s1 + $0x20] sm:$0xf] }
  0x1d   : > { %v1323_v41 = vld [vmem:[%s2025_s1 + $0x134] sm:$0xf0]  ;;  %v1158_v44 = vor.u32 %v1307_v39, %v1157_v38  ;;  %v1289_v46 = vld [vmem:[%s2025_s1 + $0x24] sm:$0xf0]  ;;  %v1149_v47 = vld [vmem:[%s2025_s1 + $0xa0] sm:$0xf] }
  0x1e   : > { %513 = vmatpush.bf16.msra.mxu0 %v1110_v24  ;;  %v1222_v45 = vor.u32 %v1323_v41, %v1221_v40  ;;  %v1305_v48 = vld [vmem:[%s2025_s1 + $0xa4] sm:$0xf0]  ;;  %v1213_v49 = vld [vmem:[%s2025_s1 + $0x120] sm:$0xf]  ;;  %s138_s8 = scalar_select %p137_p10, %s1511_s13, 1  ;;  %v1086_v51 = vor.u32 %v1289_v46, %v1085_v43  ;;  %vm701_vm0 = vcmask 523264  }
  0x1f   : > { %542 = vmatpush.bf16.msra.mxu1 %v1174_v25  ;;  %v1321_v50 = vld [vmem:[%s2025_s1 + $0x124] sm:$0xf0]  ;;  %v1077_v52 = vld [vmem:[%s2025_s1 + $0x10] sm:$0xf]  ;;  %v1150_v53 = vor.u32 %v1305_v48, %v1149_v47  ;;  %v1287_v55 = vld [vmem:[%s2025_s1 + $0x14] sm:$0xf0] }
  0x20   : > { %571 = vmatpush.bf16.msra.mxu2 %v1238_v26  ;;  %v1214_v54 = vor.u32 %v1321_v50, %v1213_v49  ;;  %v1141_v56 = vld [vmem:[%s2025_s1 + $0x90] sm:$0xf]  ;;  %s1333_s24 = smul.u32 96, %s138_s8  ;;  %v1303_v57 = vld [vmem:[%s2025_s1 + $0x94] sm:$0xf0]  ;;  %v1078_v60 = vor.u32 %v1287_v55, %v1077_v52  ;;  %s948_s8 = sshll.u32 %s136_s3, 4  ;;  %s949_s8 = int_to_ptr.vmem [resolvable:$true] %s948_s8 }
  0x21   : > { %v1205_v58 = vld [vmem:[%s2025_s1 + $0x110] sm:$0xf]  ;;  %v1319_v59 = vld [vmem:[%s2025_s1 + $0x114] sm:$0xf0]  ;;  %v1142_v61 = vor.u32 %v1303_v57, %v1141_v56  ;;  %v1069_v63 = vld [vmem:[%s2025_s1] sm:$0xf] }
  0x22   : > { %514 = vmatpush.bf16.msra.mxu0 %v1102_v33  ;;  %v1206_v62 = vor.u32 %v1319_v59, %v1205_v58  ;;  %v1285_v0 = vld [vmem:[%s2025_s1 + $0x4] sm:$0xf0]  ;;  %v1133_v1 = vld [vmem:[%s2025_s1 + $0x80] sm:$0xf]  ;;  %s1678_s17 = scalar_lea.vmem %s2024_s0, %s1333_s24  ;;  %s1472_s24 = smov 64  }
  0x23   : > { %543 = vmatpush.bf16.msra.mxu1 %v1166_v34  ;;  %v1301_v2 = vld [vmem:[%s2025_s1 + $0x84] sm:$0xf0]  ;;  %v1197_v3 = vld [vmem:[%s2025_s1 + $0x100] sm:$0xf]  ;;  %v1070_v5 = vor.u32 %v1285_v0, %v1069_v63  ;;  %v1273_v7 = vld [vmem:[%s1678_s17 + $0x8] sm:$0xf0] }
  0x24   : > { %572 = vmatpush.bf16.msra.mxu2 %v1230_v35  ;;  %v1317_v4 = vld [vmem:[%s2025_s1 + $0x104] sm:$0xf0]  ;;  %v1021_v6 = vld [vmem:[%s1678_s17] sm:$0xf]  ;;  %v1272_v8 = vld [vmem:[%s1678_s17 + $0x4] sm:$0xf]  ;;  %v1134_v9 = vor.u32 %v1301_v2, %v1133_v1 }
  0x25   : > { %v1198_v10 = vor.u32 %v1317_v4, %v1197_v3  ;;  %v1023_v11 = vld [vmem:[%s1678_s17 + $0xc] sm:$0xf0]  ;;  %v1029_v12 = vld [vmem:[%s1678_s17 + $0x8] sm:$0xf]  ;;  %v1274_v13 = vld [vmem:[%s1678_s17 + $0x10] sm:$0xf0]  ;;  %v1695_v14 = vor.u32 %v1273_v7, %v1021_v6 }
  0x26   : > { %515 = vmatpush.bf16.msra.mxu0 %v1094_v42  ;;  %v1697_v15 = vor.u32 %v1272_v8, %v1023_v11  ;;  %v1699_v16 = vor.u32 %v1274_v13, %v1029_v12  ;;  %v1033_v17 = vld [vmem:[%s1678_s17 + $0x18] sm:$0xf]  ;;  %v1276_v18 = vld [vmem:[%s1678_s17 + $0x20] sm:$0xf0]  ;;  %v1275_v19 = vld [vmem:[%s1678_s17 + $0x1c] sm:$0xf] }
  0x27   : > { %544 = vmatpush.bf16.msra.mxu1 %v1158_v44  ;;  %v1035_v20 = vld [vmem:[%s1678_s17 + $0x24] sm:$0xf0]  ;;  %v1041_v21 = vld [vmem:[%s1678_s17 + $0x20] sm:$0xf]  ;;  %v1277_v22 = vld [vmem:[%s1678_s17 + $0x28] sm:$0xf0]  ;;  %v1710_v23 = vor.u32 %v1276_v18, %v1033_v17 }
  0x28   : > { %573 = vmatpush.bf16.msra.mxu2 %v1222_v45  ;;  %v1712_v24 = vor.u32 %v1275_v19, %v1035_v20  ;;  %v1714_v25 = vor.u32 %v1277_v22, %v1041_v21  ;;  %v1045_v26 = vld [vmem:[%s1678_s17 + $0x30] sm:$0xf]  ;;  %v1279_v27 = vld [vmem:[%s1678_s17 + $0x38] sm:$0xf0]  ;;  %v1278_v28 = vld [vmem:[%s1678_s17 + $0x34] sm:$0xf] }
  0x29   : > { %v1047_v29 = vld [vmem:[%s1678_s17 + $0x3c] sm:$0xf0]  ;;  %v1053_v30 = vld [vmem:[%s1678_s17 + $0x38] sm:$0xf]  ;;  %v1280_v31 = vld [vmem:[%s1678_s17 + $0x40] sm:$0xf0]  ;;  %v1725_v32 = vor.u32 %v1279_v27, %v1045_v26 }
  0x2a   : > { %516 = vmatpush.bf16.msra.mxu0 %v1086_v51  ;;  %v1727_v33 = vor.u32 %v1278_v28, %v1047_v29  ;;  %v1729_v34 = vor.u32 %v1280_v31, %v1053_v30  ;;  %v1057_v35 = vld [vmem:[%s1678_s17 + $0x48] sm:$0xf]  ;;  %v1282_v36 = vld [vmem:[%s1678_s17 + $0x50] sm:$0xf0]  ;;  %v1281_v37 = vld [vmem:[%s1678_s17 + $0x4c] sm:$0xf] }
  0x2b   : > { %545 = vmatpush.bf16.msra.mxu1 %v1150_v53  ;;  %v1059_v38 = vld [vmem:[%s1678_s17 + $0x54] sm:$0xf0]  ;;  %v1065_v39 = vld [vmem:[%s1678_s17 + $0x50] sm:$0xf]  ;;  %v1283_v40 = vld [vmem:[%s1678_s17 + $0x58] sm:$0xf0]  ;;  %v1740_v41 = vor.u32 %v1282_v36, %v1057_v35 }
  0x2c   : > { %574 = vmatpush.bf16.msra.mxu2 %v1214_v54  ;;  %v1742_v42 = vor.u32 %v1281_v37, %v1059_v38  ;;  %v1744_v43 = vor.u32 %v1283_v40, %v1065_v39  ;;  %s1422_s17 = sshra.s32 %s951_s14, 4  ;;  %s1423_s17 = int_to_ptr.hbm [resolvable:$true] %s1422_s17 }
  0x2d   : > { %s1424_s21 = scalar_lea.hbm %s1423_s17, 64  ;;  %p1429_p0 = scmp.lt.s32.totalorder %s1423_s17, %s2026_s2 }
  0x2e   : > { %517 = vmatpush.bf16.msra.mxu0 %v1078_v60  ;;  %p1425_p11 = scmp.ne.s32.totalorder %s1423_s17, %s1424_s21  ;;  %p1430_p1 = scmp.lt.s32.totalorder %s1428_s23, %s1424_s21 }
  0x2f   : > { %546 = vmatpush.bf16.msra.mxu1 %v1142_v61 }
  0x30   : > { %575 = vmatpush.bf16.msra.mxu2 %v1206_v62  ;;  %p1426_p12 = pnand %p1425_p11, %p1528_p5  ;;  %p1431_p2 = por %p1430_p1, %p1429_p0 }
  0x32   : > { %518 = vmatpush.bf16.msra.mxu0 %v1070_v5  ;;  %p1427_p13 = pneg %p1426_p12 }
  0x33   : > { %547 = vmatpush.bf16.msra.mxu1 %v1134_v9 }
  0x34   : > { %576 = vmatpush.bf16.msra.mxu2 %v1198_v10  ;;  %p1432_p3 = pnand %p1431_p2, %p1427_p13 }
  0x35   : > { %519 = vmatmul.bf16.vlgmr.msra.gmra.mxu0 %v1695_v14 }
  0x36   : > { %548 = vmatmul.bf16.vlgmr.msra.gmra.mxu1 %v1697_v15 }
  0x37   : > { %577 = vmatmul.bf16.vlgmr.msra.gmra.mxu2 %v1699_v16 }
  0x45   : > { %524 = vmatmul.bf16.gmra.mxu0 %v1710_v23 }
  0x46   : > { %553 = vmatmul.bf16.gmra.mxu1 %v1712_v24 }
  0x47   : > { %582 = vmatmul.bf16.gmra.mxu2 %v1714_v25 }
  0x55   : > { %529 = vmatmul.bf16.gmra.mxu0 %v1725_v32 }
  0x56   : > { %558 = vmatmul.bf16.gmra.mxu1 %v1727_v33 }
  0x57   : > { %587 = vmatmul.bf16.gmra.mxu2 %v1729_v34 }
  0x65   : > { %534 = vmatmul.bf16.gmra.mxu0 %v1740_v41 }
  0x66   : > { %563 = vmatmul.bf16.gmra.mxu1 %v1742_v42 }
  0x67   : > { %592 = vmatmul.bf16.gmra.mxu2 %v1744_v43 }
  0xb2   : > { %v520_v44 = vpop.f32.mrf.mxu0 }
  0xb3   : > { %v549_v45 = vpop.f32.mrf.mxu1 }
  0xb4   : > { %v550_v63 = vadd.f32 %v549_v45, %v520_v44  ;;  %v1298_v44 = vld [vmem:[%s2025_s1 + $0x74] sm:$0xf]  ;;  %v1127_v45 = vld [vmem:[%s2025_s1 + $0x78] sm:$0xf0] }
  0xba   : > { %v578_v46 = vpop.f32.mrf.mxu2  ;;  %v522_v47 = vpop.f32.mrf.mxu0 }
  0xbb   : > { %v551_v48 = vpop.f32.mrf.mxu1  ;;  %v579_v3 = vadd.f32 %v578_v46, %v550_v63  ;;  %v1296_v46 = vld [vmem:[%s2025_s1 + $0x64] sm:$0xf]  ;;  %v1310_v63 = vld [vmem:[%s2025_s1 + $0xd4] sm:$0xf] }
  0xbc   : > { %v552_v0 = vadd.f32 %v551_v48, %v522_v47  ;;  %v1130_v47 = vor.u32 %v1298_v44, %v1127_v45  ;;  %v1119_v48 = vld [vmem:[%s2025_s1 + $0x68] sm:$0xf0]  ;;  %v1286_v45 = vld [vmem:[%s2025_s1 + $0x14] sm:$0xf] }
  0xbd   : > { %v1215_v44 = vld [vmem:[%s2025_s1 + $0x128] sm:$0xf0] }
  0xbe   : > { %598 = vmatpush.bf16.msra.mxu3 %v1130_v47 }
  0xc2   : > { %v580_v49 = vpop.f32.mrf.mxu2  ;;  %v525_v50 = vpop.f32.mrf.mxu0 }
  0xc3   : > { %v554_v51 = vpop.f32.mrf.mxu1  ;;  %v581_v1 = vadd.f32 %v580_v49, %v552_v0  ;;  %v1314_v49 = vld [vmem:[%s2025_s1 + $0xf4] sm:$0xf]  ;;  %v1175_v0 = vld [vmem:[%s2025_s1 + $0xd8] sm:$0xf0] }
  0xc4   : > { %v555_v55 = vadd.f32 %v554_v51, %v525_v50  ;;  %v1191_v50 = vld [vmem:[%s2025_s1 + $0xf8] sm:$0xf0] }
  0xc5   : > { %v685_v6 = vpack.c.bf16 %v581_v1, %v579_v3  ;;  %v1194_v51 = vor.u32 %v1314_v49, %v1191_v50  ;;  %v1326_v3 = vld [vmem:[%s2025_s1 + $0x154] sm:$0xf]  ;;  %v1143_v49 = vld [vmem:[%s2025_s1 + $0x98] sm:$0xf0] }
  0xc7   : > { %627 = vmatpush.bf16.msrb.mxu0 %v1194_v51 }
  0xca   : > { %v583_v52 = vpop.f32.mrf.mxu2  ;;  %v527_v53 = vpop.f32.mrf.mxu0 }
  0xcb   : > { %v556_v54 = vpop.f32.mrf.mxu1  ;;  %v584_v58 = vadd.f32 %v583_v52, %v555_v55  ;;  %v1330_v52 = vld [vmem:[%s2025_s1 + $0x174] sm:$0xf]  ;;  %v1312_v55 = vld [vmem:[%s2025_s1 + $0xe4] sm:$0xf] }
  0xcc   : > { %v557_v56 = vadd.f32 %v556_v54, %v527_v53  ;;  %v1122_v53 = vor.u32 %v1296_v46, %v1119_v48  ;;  %v1255_v54 = vld [vmem:[%s2025_s1 + $0x178] sm:$0xf0]  ;;  %v1302_v48 = vld [vmem:[%s2025_s1 + $0x94] sm:$0xf] }
  0xcd   : > { %v1079_v46 = vld [vmem:[%s2025_s1 + $0x18] sm:$0xf0] }
  0xce   : > { %599 = vmatpush.bf16.msra.mxu3 %v1122_v53  ;;  %v1082_v51 = vor.u32 %v1286_v45, %v1079_v46  ;;  %v1207_v53 = vld [vmem:[%s2025_s1 + $0x118] sm:$0xf0] }
  0xd2   : > { %v585_v57 = vpop.f32.mrf.mxu2  ;;  %v530_v60 = vpop.f32.mrf.mxu0 }
  0xd3   : > { %v586_v59 = vadd.f32 %v585_v57, %v557_v56  ;;  %v559_v61 = vpop.f32.mrf.mxu1  ;;  %v1183_v56 = vld [vmem:[%s2025_s1 + $0xe8] sm:$0xf0]  ;;  %v1294_v57 = vld [vmem:[%s2025_s1 + $0x54] sm:$0xf] }
  0xd4   : > { %v560_v22 = vadd.f32 %v559_v61, %v530_v60  ;;  %v1186_v60 = vor.u32 %v1312_v55, %v1183_v56  ;;  %v1328_v61 = vld [vmem:[%s2025_s1 + $0x164] sm:$0xf]  ;;  %v1071_v55 = vld [vmem:[%s2025_s1 + $0x8] sm:$0xf0]  ;;  %v1146_v56 = vor.u32 %v1302_v48, %v1143_v49 }
  0xd5   : > { %v686_v62 = vpack.c.bf16 %v586_v59, %v584_v58  ;;  %v1111_v58 = vld [vmem:[%s2025_s1 + $0x58] sm:$0xf0]  ;;  %v1258_v59 = vor.u32 %v1330_v52, %v1255_v54  ;;  %v1318_v52 = vld [vmem:[%s2025_s1 + $0x114] sm:$0xf]  ;;  %v1284_v54 = vld [vmem:[%s2025_s1 + $0x4] sm:$0xf] }
  0xd6   : > { %628 = vmatpush.bf16.msrb.mxu0 %v1186_v60  ;;  %v1074_v60 = vor.u32 %v1284_v54, %v1071_v55 }
  0xd7   : > { %695 = vrot.lane.b32.xlu1 %v686_v62, %s1472_s24  ;;  %656 = vmatpush.bf16.msrb.mxu1 %v1258_v59  ;;  %v1210_v59 = vor.u32 %v1318_v52, %v1207_v53 }
  0xda   : > { %v588_v2 = vpop.f32.mrf.mxu2  ;;  %v532_v4 = vpop.f32.mrf.mxu0 }
  0xdb   : > { %v561_v5 = vpop.f32.mrf.mxu1  ;;  %v589_v28 = vadd.f32 %v588_v2, %v560_v22  ;;  %v1114_v2 = vor.u32 %v1294_v57, %v1111_v58  ;;  %v1159_v22 = vld [vmem:[%s2025_s1 + $0xb8] sm:$0xf0]  ;;  %v1300_v57 = vld [vmem:[%s2025_s1 + $0x84] sm:$0xf]  ;;  %v1135_v58 = vld [vmem:[%s2025_s1 + $0x88] sm:$0xf0] }
  0xdc   : > { %v562_v26 = vadd.f32 %v561_v5, %v532_v4  ;;  %v1239_v4 = vld [vmem:[%s2025_s1 + $0x158] sm:$0xf0]  ;;  %v1292_v5 = vld [vmem:[%s2025_s1 + $0x44] sm:$0xf] }
  0xdd   : > { %600 = vmatpush.bf16.msra.mxu3 %v1114_v2 }
  0xdf   : > { %693 = vrot.lane.b32.xlu1 %v685_v6, %s1472_s24 }
  0xe2   : > { %v590_v7 = vpop.f32.mrf.mxu2  ;;  %v535_v8 = vpop.f32.mrf.mxu0 }
  0xe3   : > { %v564_v9 = vpop.f32.mrf.mxu1  ;;  %v591_v27 = vadd.f32 %v590_v7, %v562_v26  ;;  %v1178_v7 = vor.u32 %v1310_v63, %v1175_v0  ;;  %v1138_v63 = vor.u32 %v1300_v57, %v1135_v58 }
  0xe4   : > { %v565_v13 = vadd.f32 %v564_v9, %v535_v8  ;;  %v1308_v8 = vld [vmem:[%s2025_s1 + $0xc4] sm:$0xf]  ;;  %v1167_v9 = vld [vmem:[%s2025_s1 + $0xc8] sm:$0xf0] }
  0xe5   : > { %v1752_v29 = vpack.c.bf16 %v591_v27, %v589_v28  ;;  %629 = vmatpush.bf16.msrb.mxu0 %v1178_v7  ;;  %v1322_v28 = vld [vmem:[%s2025_s1 + $0x134] sm:$0xf] }
  0xea   : > { %v593_v10 = vpop.f32.mrf.mxu2  ;;  %v537_v11 = vpop.f32.mrf.mxu0 }
  0xeb   : > { %v566_v12 = vpop.f32.mrf.mxu1  ;;  %v594_v19 = vadd.f32 %v593_v10, %v565_v13  ;;  %v1242_v10 = vor.u32 %v1326_v3, %v1239_v4  ;;  %v1231_v13 = vld [vmem:[%s2025_s1 + $0x148] sm:$0xf0] }
  0xec   : > { %v567_v17 = vadd.f32 %v566_v12, %v537_v11  ;;  %v1324_v12 = vld [vmem:[%s2025_s1 + $0x144] sm:$0xf] }
  0xed   : > { %v1234_v26 = vor.u32 %v1324_v12, %v1231_v13 }
  0xf2   : > { %v595_v18 = vpop.f32.mrf.mxu2 }
  0xf3   : > { %v596_v20 = vadd.f32 %v595_v18, %v567_v17  ;;  %v1290_v17 = vld [vmem:[%s2025_s1 + $0x34] sm:$0xf]  ;;  %v1095_v18 = vld [vmem:[%s2025_s1 + $0x38] sm:$0xf0] }
  0xf4   : > { %v1098_v27 = vor.u32 %v1290_v17, %v1095_v18 }
  0xf5   : > { %v1749_v21 = vpack.c.bf16 %v596_v20, %v594_v19  ;;  %v1170_v19 = vor.u32 %v1308_v8, %v1167_v9  ;;  %v1306_v20 = vld [vmem:[%s2025_s1 + $0xb4] sm:$0xf] }
  0xf7   : > { %699 = vrot.lane.b32.xlu0 %v1749_v21, %s1472_s24  ;;  %630 = vmatpush.bf16.msrb.mxu0 %v1170_v19 }
  0xff   : > { %697 = vrot.lane.b32.xlu0 %v1752_v29, %s1472_s24 }
 0x149   : > { %v696_v37 = vpop.permute.xlu1 %695 }
 0x14a   : > { %v718_v38 = vsel %vm701_vm0, %v696_v37, 0  ;;  %v1304_v37 = vld [vmem:[%s2025_s1 + $0xa4] sm:$0xf] }
 0x151   : > { %v694_v39 = vpop.permute.xlu1 %693 }
 0x152   : > { %v715_v40 = vsel %vm701_vm0, %v694_v39, 0 }
 0x169   : > { %v700_v30 = vpop.permute.xlu0 %699 }
 0x16a   : > { %v724_v31 = vsel %vm701_vm0, %v700_v30, 0  ;;  %v1223_v30 = vld [vmem:[%s2025_s1 + $0x138] sm:$0xf0] }
 0x16b   : > { %730 = vmatpush.bf16.xpose.msrb.mxu2 %v724_v31  ;;  %v1288_v31 = vld [vmem:[%s2025_s1 + $0x24] sm:$0xf] }
 0x171   : > { %v698_v35 = vpop.permute.xlu0 %697 }
 0x172   : > { %v721_v36 = vsel %vm701_vm0, %v698_v35, 0  ;;  %v1087_v35 = vld [vmem:[%s2025_s1 + $0x28] sm:$0xf0] }
 0x173   : > { %731 = vmatpush.bf16.xpose.msrb.mxu2 %v721_v36  ;;  %v1162_v36 = vor.u32 %v1306_v20, %v1159_v22  ;;  %v1090_v39 = vor.u32 %v1288_v31, %v1087_v35 }
 0x175   : > { %631 = vmatpush.bf16.msrb.mxu0 %v1162_v36 }
 0x17b   : > { %732 = vmatpush.bf16.xpose.msrb.mxu2 %v718_v38  ;;  %v1151_v38 = vld [vmem:[%s2025_s1 + $0xa8] sm:$0xf0] }
 0x17c   : > { %v1154_v47 = vor.u32 %v1304_v37, %v1151_v38 }
 0x17e   : > { %632 = vmatpush.bf16.msrb.mxu0 %v1154_v47 }
 0x182   : > { %633 = vmatpush.bf16.msrb.mxu0 %v1146_v56 }
 0x183   : > { %733 = vmatpush.bf16.xpose.msrb.mxu2 %v715_v40  ;;  %v1320_v40 = vld [vmem:[%s2025_s1 + $0x124] sm:$0xf] }
 0x184   : > { %v1218_v50 = vor.u32 %v1320_v40, %v1215_v44 }
 0x186   : > { %634 = vmatpush.bf16.msrb.mxu0 %v1138_v63 }
 0x189   : > { %635 = vmatmul.bf16.vlgmr.msrb.gmra.mxu0 %v1697_v15 }
 0x18a   : > { %1259 = vmatmul.msk.bf16.vlgmr.msrb.gmra.mxu2 %vm701_vm0, %v685_v6  ;;  %v1103_v6 = vld [vmem:[%s2025_s1 + $0x48] sm:$0xf0] }
 0x18b   : > { %v1106_v11 = vor.u32 %v1292_v5, %v1103_v6 }
 0x18d   : > { %601 = vmatpush.bf16.msra.mxu3 %v1106_v11 }
 0x191   : > { %602 = vmatpush.bf16.msra.mxu3 %v1098_v27 }
 0x195   : > { %603 = vmatpush.bf16.msra.mxu3 %v1090_v39 }
 0x199   : > { %604 = vmatpush.bf16.msra.mxu3 %v1082_v51  ;;  %640 = vmatmul.bf16.gmra.mxu0 %v1712_v24 }
 0x19a   : > { %1260 = vmatmul.msk.bf16.gmra.mxu2 %vm701_vm0, %v686_v62  ;;  %v1247_v62 = vld [vmem:[%s2025_s1 + $0x168] sm:$0xf0] }
 0x19b   : > { %v1250_v1 = vor.u32 %v1328_v61, %v1247_v62  ;;  %v1316_v61 = vld [vmem:[%s2025_s1 + $0x104] sm:$0xf]  ;;  %v1199_v62 = vld [vmem:[%s2025_s1 + $0x108] sm:$0xf0] }
 0x19c   : > { %v1202_v0 = vor.u32 %v1316_v61, %v1199_v62 }
 0x19d   : > { %657 = vmatpush.bf16.msrb.mxu1 %v1250_v1  ;;  %605 = vmatpush.bf16.msra.mxu3 %v1074_v60 }
 0x1a0   : > { %606 = vmatmul.bf16.vlgmr.msra.gmra.mxu3 %v1695_v14  ;;  %v763_v14 = vlaneseq }
 0x1a1   : > { %658 = vmatpush.bf16.msrb.mxu1 %v1242_v10 }
 0x1a2   : > { %v764_v15 = vshrl.u32 %v763_v14, 7 }
 0x1a4   : > { %v767_v5 = vadd.s32 24, %v764_v15  ;;  %v768_v10 = vadd.s32 32, %v764_v15  ;;  %v769_v18 = vadd.s32 40, %v764_v15  ;;  %v770_v27 = vadd.s32 48, %v764_v15 }
 0x1a5   : > { %659 = vmatpush.bf16.msrb.mxu1 %v1234_v26 }
 0x1a9   : > { %645 = vmatmul.bf16.gmra.mxu0 %v1727_v33 }
 0x1aa   : > { %1261 = vmatmul.msk.bf16.gmra.mxu2 %vm701_vm0, %v1752_v29  ;;  %v1226_v29 = vor.u32 %v1322_v28, %v1223_v30 }
 0x1ac   : > { %660 = vmatpush.bf16.msrb.mxu1 %v1226_v29  ;;  %v771_v29 = vadd.s32 56, %v764_v15 }
 0x1b0   : > { %661 = vmatpush.bf16.msrb.mxu1 %v1218_v50  ;;  %611 = vmatmul.bf16.gmra.mxu3 %v1710_v23 }
 0x1b4   : > { %662 = vmatpush.bf16.msrb.mxu1 %v1210_v59 }
 0x1b8   : > { %663 = vmatpush.bf16.msrb.mxu1 %v1202_v0 }
 0x1b9   : > { %650 = vmatmul.bf16.gmra.mxu0 %v1742_v42 }
 0x1ba   : > { %1262 = vmatmul.msk.bf16.gmra.mxu2 %vm701_vm0, %v1749_v21 }
 0x1bb   : > { %664 = vmatmul.bf16.vlgmr.msrb.gmra.mxu1 %v1699_v16  ;;  %v773_v16 = vand.u32 127, %v763_v14 }
 0x1bd   : > { %vm774_vm1 = vcmp.ge.s32.totalorder %v764_v15, %v773_v16  ;;  %vm777_vm4 = vcmp.ge.s32.totalorder %v767_v5, %v773_v16  ;;  %vm778_vm5 = vcmp.ge.s32.totalorder %v768_v10, %v773_v16  ;;  %vm779_vm6 = vcmp.ge.s32.totalorder %v769_v18, %v773_v16 }
 0x1be   : > { %vm780_vm7 = vcmp.ge.s32.totalorder %v770_v27, %v773_v16  ;;  %vm781_vm8 = vcmp.ge.s32.totalorder %v771_v29, %v773_v16 }
 0x1c0   : > { %616 = vmatmul.bf16.gmra.mxu3 %v1725_v32  ;;  %v765_v32 = vadd.s32 8, %v764_v15 }
 0x1c2   : > { %vm775_vm2 = vcmp.ge.s32.totalorder %v765_v32, %v773_v16 }
 0x1cb   : > { %669 = vmatmul.bf16.gmra.mxu1 %v1714_v25 }
 0x1d0   : > { %621 = vmatmul.bf16.gmra.mxu3 %v1740_v41 }
 0x1db   : > { %674 = vmatmul.bf16.gmra.mxu1 %v1729_v34 }
 0x1eb   : > { %679 = vmatmul.bf16.gmra.mxu1 %v1744_v43  ;;  %v766_v43 = vadd.s32 16, %v764_v15 }
 0x1ed   : > { %vm776_vm3 = vcmp.ge.s32.totalorder %v766_v43, %v773_v16 }
 0x206   : > { %v636_v35 = vpop.f32.mrf.mxu0 }
 0x20d   : > { %v735_v23 = vpop.f32.mrf.mxu2 }
 0x20e   : > { %v755_v24 = vmul.f32 0.125, %v735_v23  ;;  %v638_v49 = vpop.f32.mrf.mxu0 }
 0x210   : > { %v1921_v21 = vsel %vm774_vm1, %v755_v24, -inf }
 0x211   : > { %v790_v25 = vsel %vm701_vm0, %v1921_v21, -inf }
 0x212   : > { %791 = vmax.xlane.f32.xlu2 %v790_v25 }
 0x215   : > { %v737_v33 = vpop.f32.mrf.mxu2 }
 0x216   : > { %v756_v34 = vmul.f32 0.125, %v737_v33  ;;  %v641_v52 = vpop.f32.mrf.mxu0 }
 0x218   : > { %v1925_v41 = vsel %vm775_vm2, %v756_v34, -inf }
 0x219   : > { %v793_v42 = vsel %vm701_vm0, %v1925_v41, -inf }
 0x21a   : > { %794 = vmax.xlane.f32.xlu2 %v793_v42 }
 0x21d   : > { %v740_v1 = vpop.f32.mrf.mxu2 }
 0x21e   : > { %v757_v2 = vmul.f32 0.125, %v740_v1  ;;  %v643_v55 = vpop.f32.mrf.mxu0 }
 0x220   : > { %v1929_v3 = vsel %vm776_vm3, %v757_v2, -inf }
 0x221   : > { %v796_v4 = vsel %vm701_vm0, %v1929_v3, -inf }
 0x222   : > { %797 = vmax.xlane.f32.xlu0 %v796_v4 }
 0x223   : > { %v607_v31 = vpop.f32.mrf.mxu3 }
 0x224   : > { %v637_v37 = vadd.f32 %v636_v35, %v607_v31 }
 0x225   : > { %v742_v6 = vpop.f32.mrf.mxu2 }
 0x226   : > { %v758_v7 = vmul.f32 0.125, %v742_v6  ;;  %v646_v58 = vpop.f32.mrf.mxu0 }
 0x228   : > { %v1933_v8 = vsel %vm777_vm4, %v758_v7, -inf }
 0x229   : > { %v799_v9 = vsel %vm701_vm0, %v1933_v8, -inf }
 0x22a   : > { %800 = vmax.xlane.f32.xlu1 %v799_v9 }
 0x22b   : > { %v609_v48 = vpop.f32.mrf.mxu3 }
 0x22c   : > { %v639_v27 = vadd.f32 %v638_v49, %v609_v48 }
 0x22d   : > { %v745_v11 = vpop.f32.mrf.mxu2 }
 0x22e   : > { %v759_v12 = vmul.f32 0.125, %v745_v11  ;;  %v648_v61 = vpop.f32.mrf.mxu0 }
 0x230   : > { %v1937_v13 = vsel %vm778_vm5, %v759_v12, -inf }
 0x231   : > { %v802_v17 = vsel %vm701_vm0, %v1937_v13, -inf }
 0x232   : > { %803 = vmax.xlane.f32.xlu2 %v802_v17 }
 0x233   : > { %v612_v51 = vpop.f32.mrf.mxu3 }
 0x235   : > { %v747_v19 = vpop.f32.mrf.mxu2 }
 0x236   : > { %v760_v20 = vmul.f32 0.125, %v747_v19  ;;  %v651_v16 = vpop.f32.mrf.mxu0  ;;  %v642_v19 = vadd.f32 %v641_v52, %v612_v51 }
 0x238   : > { %v1941_v22 = vsel %vm779_vm6, %v760_v20, -inf  ;;  %v665_v39 = vpop.f32.mrf.mxu1 }
 0x239   : > { %v805_v26 = vsel %vm701_vm0, %v1941_v22, -inf  ;;  %v1949_v40 = vadd.f32 %v665_v39, %v637_v37 }
 0x23a   : > { %806 = vmax.xlane.f32.xlu2 %v805_v26 }
 0x23b   : > { %v614_v54 = vpop.f32.mrf.mxu3 }
 0x23c   : > { %v644_v20 = vadd.f32 %v643_v55, %v614_v54 }
 0x23d   : > { %v750_v28 = vpop.f32.mrf.mxu2 }
 0x23e   : > { %v761_v30 = vmul.f32 0.125, %v750_v28  ;;  %v653_v1 = vpop.f32.mrf.mxu0 }
 0x240   : > { %v1945_v36 = vsel %vm780_vm7, %v761_v30, -inf  ;;  %v667_v50 = vpop.f32.mrf.mxu1 }
 0x241   : > { %v808_v38 = vsel %vm701_vm0, %v1945_v36, -inf }
 0x242   : > { %809 = vmax.xlane.f32.xlu2 %v808_v38  ;;  %v668_v38 = vadd.f32 %v667_v50, %v639_v27 }
 0x243   : > { %v617_v57 = vpop.f32.mrf.mxu3 }
 0x244   : > { %v647_v4 = vadd.f32 %v646_v58, %v617_v57 }
 0x245   : > { %v752_v44 = vpop.f32.mrf.mxu2 }
 0x246   : > { %v762_v45 = vmul.f32 0.125, %v752_v44 }
 0x248   : > { %v1951_v46 = vsel %vm781_vm8, %v762_v45, -inf  ;;  %v670_v53 = vpop.f32.mrf.mxu1  ;;  %v882_v45 = vpack.c.bf16 %v668_v38, %v1949_v40 }
 0x249   : > { %v811_v47 = vsel %vm701_vm0, %v1951_v46, -inf }
 0x24a   : > { %812 = vmax.xlane.f32.xlu2 %v811_v47 }
 0x24b   : > { %v619_v60 = vpop.f32.mrf.mxu3 }
 0x24c   : > { %v649_v5 = vadd.f32 %v648_v61, %v619_v60 }
 0x250   : > { %v672_v56 = vpop.f32.mrf.mxu1 }
 0x251   : > { %v673_v31 = vadd.f32 %v672_v56, %v644_v20 }
 0x253   : > { %v622_v15 = vpop.f32.mrf.mxu3 }
 0x254   : > { %v652_v42 = vadd.f32 %v651_v16, %v622_v15 }
 0x258   : > { %v675_v59 = vpop.f32.mrf.mxu1 }
 0x259   : > { %v676_v12 = vadd.f32 %v675_v59, %v647_v4 }
 0x25b   : > { %v624_v43 = vpop.f32.mrf.mxu3 }
 0x260   : > { %v677_v62 = vpop.f32.mrf.mxu1 }
 0x261   : > { %v678_v17 = vadd.f32 %v677_v62, %v649_v5 }
 0x263   : > { %v884_v28 = vpack.c.bf16 %v678_v17, %v676_v12 }
 0x268   : > { %v680_v23 = vpop.f32.mrf.mxu1 }
 0x269   : > { %v681_v9 = vadd.f32 %v680_v23, %v652_v42 }
 0x270   : > { %v682_v2 = vpop.f32.mrf.mxu1 }
 0x285   : > { %v792_v63 = vpop.xlane.xlu2 %791 }
 0x286   : > { %v814_v0 = vsub.f32 %v1921_v21, %v792_v63  ;;  %v654_v21 = vadd.f32 %v653_v1, %v624_v43 }
 0x288   : > { %v822_v14 = vmul.f32 1.442695, %v814_v0 }
 0x28a   : > { %1376 = vpow2.f32 %v822_v14 }
 0x28d   : > { %v795_v24 = vpop.xlane.xlu2 %794 }
 0x28e   : > { %v815_v25 = vsub.f32 %v1925_v41, %v795_v24  ;;  %v683_v41 = vadd.f32 %v682_v2, %v654_v21 }
 0x290   : > { %v1957_v32 = vpop.eup %1376  ;;  %v824_v33 = vmul.f32 1.442695, %v815_v25  ;;  %v885_v26 = vpack.c.bf16 %v683_v41, %v681_v9 }
 0x291   : > { %v838_v34 = vsel %vm701_vm0, %v1957_v32, 0.0 }
 0x292   : > { %1378 = vpow2.f32 %v824_v33  ;;  %839 = vadd.xlane.f32.xlu2 %v838_v34  ;;  %902 = vmatpush.bf16.msrb.mxu3 %v885_v26 }
 0x295   : > { %v798_v6 = vpop.xlane.xlu0 %797 }
 0x296   : > { %v816_v7 = vsub.f32 %v1929_v3, %v798_v6  ;;  %v671_v3 = vadd.f32 %v670_v53, %v642_v19  ;;  %903 = vmatpush.bf16.msrb.mxu3 %v884_v28 }
 0x298   : > { %v1962_v10 = vpop.eup %1378  ;;  %v826_v11 = vmul.f32 1.442695, %v816_v7  ;;  %v883_v44 = vpack.c.bf16 %v673_v31, %v671_v3 }
 0x299   : > { %v841_v18 = vsel %vm701_vm0, %v1962_v10, 0.0 }
 0x29a   : > { %1380 = vpow2.f32 %v826_v11  ;;  %842 = vadd.xlane.f32.xlu2 %v841_v18  ;;  %904 = vmatpush.bf16.msrb.mxu3 %v883_v44 }
 0x29d   : > { %v801_v30 = vpop.xlane.xlu1 %800 }
 0x29e   : > { %v817_v35 = vsub.f32 %v1933_v8, %v801_v30  ;;  %905 = vmatpush.bf16.msrb.mxu3 %v882_v45 }
 0x2a0   : > { %v1381_v37 = vpop.eup %1380  ;;  %v828_v29 = vmul.f32 1.442695, %v817_v35 }
 0x2a1   : > { %v844_v39 = vsel %vm701_vm0, %v1381_v37, 0.0 }
 0x2a2   : > { %1382 = vpow2.f32 %v828_v29  ;;  %845 = vadd.xlane.f32.xlu0 %v844_v39 }
 0x2a5   : > { %v804_v47 = vpop.xlane.xlu2 %803 }
 0x2a6   : > { %v818_v48 = vsub.f32 %v1937_v13, %v804_v47 }
 0x2a8   : > { %v1383_v49 = vpop.eup %1382  ;;  %v830_v51 = vmul.f32 1.442695, %v818_v48 }
 0x2a9   : > { %v847_v8 = vsel %vm701_vm0, %v1383_v49, 0.0 }
 0x2aa   : > { %1384 = vpow2.f32 %v830_v51  ;;  %848 = vadd.xlane.f32.xlu1 %v847_v8 }
 0x2ad   : > { %v807_v50 = vpop.xlane.xlu2 %806 }
 0x2ae   : > { %v819_v52 = vsub.f32 %v1941_v22, %v807_v50 }
 0x2b0   : > { %v1385_v53 = vpop.eup %1384  ;;  %v832_v54 = vmul.f32 1.442695, %v819_v52 }
 0x2b1   : > { %v850_v55 = vsel %vm701_vm0, %v1385_v53, 0.0 }
 0x2b2   : > { %1386 = vpow2.f32 %v832_v54  ;;  %851 = vadd.xlane.f32.xlu2 %v850_v55 }
 0x2b5   : > { %v810_v40 = vpop.xlane.xlu2 %809 }
 0x2b6   : > { %v820_v56 = vsub.f32 %v1945_v36, %v810_v40 }
 0x2b8   : > { %v1387_v13 = vpop.eup %1386  ;;  %v834_v57 = vmul.f32 1.442695, %v820_v56 }
 0x2b9   : > { %v853_v58 = vsel %vm701_vm0, %v1387_v13, 0.0 }
 0x2ba   : > { %1388 = vpow2.f32 %v834_v57  ;;  %854 = vadd.xlane.f32.xlu0 %v853_v58 }
 0x2bd   : > { %v813_v59 = vpop.xlane.xlu2 %812 }
 0x2be   : > { %v821_v60 = vsub.f32 %v1951_v46, %v813_v59 }
 0x2c0   : > { %v1389_v61 = vpop.eup %1388  ;;  %v836_v22 = vmul.f32 1.442695, %v821_v60 }
 0x2c1   : > { %v856_v62 = vsel %vm701_vm0, %v1389_v61, 0.0 }
 0x2c2   : > { %1390 = vpow2.f32 %v836_v22  ;;  %857 = vadd.xlane.f32.xlu1 %v856_v62 }
 0x2c8   : > { %v1391_v63 = vpop.eup %1390 }
 0x2c9   : > { %v859_v0 = vsel %vm701_vm0, %v1391_v63, 0.0 }
 0x2ca   : > { %860 = vadd.xlane.f32.xlu2 %v859_v0 }
 0x305   : > { %v840_v36 = vpop.xlane.xlu2 %839 }
 0x306   : > { %1392 = vrcp.f32 %v840_v36 }
 0x30c   : > { %v1393_v15 = vpop.eup %1392 }
 0x30d   : > { %v843_v14 = vpop.xlane.xlu2 %842  ;;  %v870_v23 = vmul.f32 %v1393_v15, %v1957_v32 }
 0x30e   : > { %1394 = vrcp.f32 %v843_v14 }
 0x314   : > { %v1395_v16 = vpop.eup %1394 }
 0x315   : > { %v871_v46 = vmul.f32 %v1395_v16, %v1962_v10  ;;  %v846_v25 = vpop.xlane.xlu0 %845 }
 0x316   : > { %1396 = vrcp.f32 %v846_v25 }
 0x317   : > { %v878_v24 = vpack.c.bf16 %v871_v46, %v870_v23 }
 0x319   : > { %1263 = vmatmul.msk.bf16.vlgmr.msrb.gmra.mxu3 %vm701_vm0, %v878_v24 }
 0x31c   : > { %v1397_v34 = vpop.eup %1396 }
 0x31d   : > { %v849_v33 = vpop.xlane.xlu1 %848  ;;  %v872_v43 = vmul.f32 %v1397_v34, %v1381_v37 }
 0x31e   : > { %1398 = vrcp.f32 %v849_v33 }
 0x324   : > { %v1399_v42 = vpop.eup %1398 }
 0x325   : > { %v873_v1 = vmul.f32 %v1399_v42, %v1383_v49  ;;  %v852_v2 = vpop.xlane.xlu2 %851 }
 0x326   : > { %1400 = vrcp.f32 %v852_v2 }
 0x327   : > { %v879_v21 = vpack.c.bf16 %v873_v1, %v872_v43 }
 0x329   : > { %1264 = vmatmul.msk.bf16.gmra.mxu3 %vm701_vm0, %v879_v21 }
 0x32c   : > { %v1401_v32 = vpop.eup %1400 }
 0x32d   : > { %v855_v4 = vpop.xlane.xlu0 %854  ;;  %v874_v6 = vmul.f32 %v1401_v32, %v1385_v53 }
 0x32e   : > { %1402 = vrcp.f32 %v855_v4 }
 0x334   : > { %v1403_v5 = vpop.eup %1402 }
 0x335   : > { %v875_v7 = vmul.f32 %v1403_v5, %v1387_v13  ;;  %v858_v41 = vpop.xlane.xlu1 %857 }
 0x336   : > { %1404 = vrcp.f32 %v858_v41 }
 0x337   : > { %v880_v9 = vpack.c.bf16 %v875_v7, %v874_v6 }
 0x339   : > { %1265 = vmatmul.msk.bf16.gmra.mxu3 %vm701_vm0, %v880_v9 }
 0x33c   : > { %v1405_v11 = vpop.eup %1404 }
 0x33d   : > { %v861_v10 = vpop.xlane.xlu2 %860  ;;  %v876_v17 = vmul.f32 %v1405_v11, %v1389_v61 }
 0x33e   : > { %1406 = vrcp.f32 %v861_v10 }
 0x344   : > { %v1407_v12 = vpop.eup %1406 }
 0x345   : > { %v877_v18 = vmul.f32 %v1407_v12, %v1391_v63 }
 0x347   : > { %v881_v19 = vpack.c.bf16 %v877_v18, %v876_v17 }
 0x349   : > { %1266 = vmatmul.msk.bf16.gmra.mxu3 %vm701_vm0, %v881_v19 }
 0x39c   : > { %v907_v20 = vpop.f32.mrf.mxu3 }
 0x39d   : > { %927 = vst.msk [vmem:[%s136_s3] sm:$0xff] %vm701_vm0, %v907_v20 }
 0x3a4   : > { %v909_v26 = vpop.f32.mrf.mxu3 }
 0x3a5   : > { %928 = vst.msk [vmem:[%s136_s3 + $0x8] sm:$0xff] %vm701_vm0, %v909_v26 }
 0x3ac   : > { %v912_v27 = vpop.f32.mrf.mxu3 }
 0x3ad   : > { %929 = vst.msk [vmem:[%s136_s3 + $0x10] sm:$0xff] %vm701_vm0, %v912_v27 }
 0x3b4   : > { %v914_v28 = vpop.f32.mrf.mxu3 }
 0x3b5   : > { %930 = vst.msk [vmem:[%s136_s3 + $0x18] sm:$0xff] %vm701_vm0, %v914_v28 }
 0x3bc   : > { %v917_v30 = vpop.f32.mrf.mxu3 }
 0x3bd   : > { %931 = vst.msk [vmem:[%s136_s3 + $0x20] sm:$0xff] %vm701_vm0, %v917_v30 }
 0x3c4   : > { %v919_v3 = vpop.f32.mrf.mxu3 }
 0x3c5   : > { %932 = vst.msk [vmem:[%s136_s3 + $0x28] sm:$0xff] %vm701_vm0, %v919_v3 }
 0x3cc   : > { %v922_v31 = vpop.f32.mrf.mxu3 }
 0x3cd   : > { %933 = vst.msk [vmem:[%s136_s3 + $0x30] sm:$0xff] %vm701_vm0, %v922_v31 }
 0x3d4   : > { %v924_v35 = vpop.f32.mrf.mxu3 }
 0x3d5   : > { %934 = vst.msk [vmem:[%s136_s3 + $0x38] sm:$0xff] %vm701_vm0, %v924_v35 }
 0x3d6   : > { %1435 = shalt.err (!%p1432_p3)
}
 0x3d7   : > { %s1473_s27 = smov 128   ;;  %s1474_s24 = smov 8  }
 0x3d8   : > { %1334 = dma.vmem_to_hbm [thread:$0]  (%p1528_p5), %s949_s8, 1024, %s951_s14, %s936_s16, %s1473_s27, %s1473_s27, %s1474_s24  }
 0x3d9 PF: > { %p1340_p4 = scmp.ge.s32.totalorder %s1470_s12, 2  ;;  %s965_s28 = sand.u32 1, %s1458_s9  }
 0x3da   : > { %s966_s29 = scalar_lea.sflag [#allocation3], %s965_s28 }
 0x3db   : > { %p1337_p7 = pnand %p1340_p4, %p1532_p6 }
 0x3dd   : > { %p1338_p8 = pneg %p1337_p7 }
 0x3df   : > { %1453 = dma.done.wait (%p1338_p8), %s966_s29, 1024  }
 0x3e0   : > { %1455 = vsyncadd (%p1338_p8), %s966_s29, 4294966272  ;;  %p12_p9 = scmp.ge.s32.totalorder %s1515_s15, 4   ;;  %s2029_s9 = smov %s1462_s10 }
 0x3e1   : > { %s2030_s10 = smov %s1466_s11  ;;  %s2031_s11 = smov %s1526_s18 }
 0x3e2   : > { %s2032_s12 = smov %s1515_s15  ;;  %14 = sbr.rel (!%p12_p9) target bundleno = 3 (0x3), region = 63 }
 0x3e7   :  { %972 = vsyncpa [#allocation3], 1 }
 0x3e8   :  { %974 = vsyncpa [#allocation3 + $0x1], 1 }

</bundles_post_ra>
